<compile_context>
chip_gen: v7x
topology: tpu7x:2x2x1
jax: 0.10.0
libtpu: 0.0.40
codegen_flags: <defaults>
</compile_context>

<pallas_src>
import functools

import jax
import jax.numpy as jnp
from jax.experimental import pallas as pl
from jax.experimental.pallas import tpu as pltpu

_MAX_TM = 1024  # rows per block; 1024 x 512 f32 = 2 MiB -> <= 8 MiB double-buffered i/o


def _contrast_kernel(factor_ref, x_ref, o_ref):
    # factor_ref: SMEM (N,) f32 -- scalar-prefetched per-sample contrast factors
    # x_ref/o_ref: VMEM (1, TM, LANE) lane-dense tile of sample program_id(0)
    f = factor_ref[pl.program_id(0)]
    o_ref[...] = jnp.clip(x_ref[...] * f, 0.0, 1.0)


def _round_up(x, m):
    return ((x + m - 1) // m) * m


def _choose_layout(flat, n):
    # Lane: largest of {512, 256, 128} dividing flat -> free reshape, zero padding.
    lane = next((c for c in (512, 256, 128) if flat % c == 0), None)
    if lane is None:
        # Rare fallback: pad the tail up to a multiple of 128 lanes.
        lane = 128
        padded_flat = _round_up(flat, lane)
    else:
        padded_flat = flat
    rows = padded_flat // lane

    # Row tile: full extent when small (block == full dim, no (8,128) issue),
    # else 1024-row blocks (multiple of 8; ragged tail masked by Pallas).
    tm = rows if rows <= _MAX_TM else _MAX_TM

    # v7x: expose >= 2 parallel grid units so both TensorCores get work even
    # for single-image calls.  tm stays a multiple of 8 and < rows.
    if n * pl.cdiv(rows, tm) < 2 and rows >= 16:
        tm = _round_up(pl.cdiv(rows, 2), 8)

    return lane, rows, tm, padded_flat


@functools.partial(jax.jit, donate_argnums=(0,))
def random_contrast_pallas(x_nchw, factors):
    """x_nchw: (N, C, H, W) float32 (donated); factors: (N,) float32 in [a, b]."""
    N, C, H, W = x_nchw.shape
    flat = C * H * W
    lane, rows, tm, padded_flat = _choose_layout(flat, N)

    x2d = x_nchw.reshape(N, flat)
    if padded_flat != flat:
        # Fallback only: zero pad the tail; clamp(0 * f) == 0, sliced off after.
        x2d = jnp.pad(x2d, ((0, 0), (0, padded_flat - flat)))
    x3d = x2d.reshape(N, rows, lane)

    n_row_tiles = pl.cdiv(rows, tm)
    itemsize = jnp.dtype(x3d.dtype).itemsize

    out3d = pl.pallas_call(
        _contrast_kernel,
        out_shape=jax.ShapeDtypeStruct((N, rows, lane), x3d.dtype),
        grid_spec=pltpu.PrefetchScalarGridSpec(
            num_scalar_prefetch=1,
            grid=(N, n_row_tiles),
            in_specs=[pl.BlockSpec((1, tm, lane), lambda i, j, fac: (i, j, 0))],
            out_specs=pl.BlockSpec((1, tm, lane), lambda i, j, fac: (i, j, 0)),
        ),
        compiler_params=pltpu.CompilerParams(
            dimension_semantics=("parallel", "parallel"),
        ),
        cost_estimate=pl.CostEstimate(
            flops=3 * N * flat,              # mul + max + min per element
            transcendentals=0,
            bytes_accessed=2 * N * flat * itemsize,
        ),
        # Image input (arg index 1, after the scalar-prefetch factors) aliases
        # the output buffer; combined with donate_argnums this avoids an extra
        # HBM allocation / defensive copy around the custom call.
        input_output_aliases={1: 0},
    )(factors, x3d)

    out2d = out3d.reshape(N, padded_flat)
    if padded_flat != flat:
        out2d = out2d[:, :flat]
    return out2d.reshape(N, C, H, W)


def random_contrast(x_nchw, a, b, key):
    """Full module forward: sample per-sample factors (p=1.0) then apply kernel.

    Note: the image buffer is donated (aliased to the output); do not reuse
    `x_nchw` after this call.
    """
    N = x_nchw.shape[0]
    factors = jax.random.uniform(key, (N,), dtype=jnp.float32, minval=a, maxval=b)
    return random_contrast_pallas(x_nchw, factors), factors


if __name__ == "__main__":
    # Deterministic example inputs (small shapes consistent with an NCHW image batch).
    a, b = 0.5, 1.5
    key = jax.random.PRNGKey(0)
    k_img, k_fac = jax.random.split(key)

    N, C, H, W = 2, 4, 16, 16
    x = jax.random.uniform(k_img, (N, C, H, W), dtype=jnp.float32)  # images in [0, 1]
    factors = jax.random.uniform(k_fac, (N,), dtype=jnp.float32, minval=a, maxval=b)

    # Reference computed BEFORE the kernel call (the kernel donates the image buffer).
    ref = jnp.clip(x * factors.reshape(N, 1, 1, 1), 0.0, 1.0)
    ref = jax.block_until_ready(ref)

    out = random_contrast_pallas(x, factors)
    out = jax.block_until_ready(out)

    assert out.shape == (N, C, H, W)
    assert jnp.allclose(out, ref, atol=1e-6), "mismatch vs reference"

    print("KERNEL_OK")
</pallas_src>

<mosaic_0001>
module attributes {stable_mosaic.version = 11 : i64} {
  func.func @_contrast_kernel(%arg0: i32, %arg1: i32, %arg2: memref<2xf32, #tpu.memory_space<smem>>, %arg3: memref<1x2x512xf32, #tpu.memory_space<vmem>>, %arg4: memref<1x2x512xf32, #tpu.memory_space<vmem>>) attributes {dimension_semantics = [#tpu.dimension_semantics<parallel>, #tpu.dimension_semantics<parallel>], iteration_bounds = array<i64: 2, 1>, scalar_prefetch = 1 : i64, scratch_operands = 0 : i64, tpu.core_type = #tpu.core_type<tc>, window_params = [{transform_indices = @transform_0, window_bounds = array<i64: 1, 2, 512>}, {transform_indices = @transform_1, window_bounds = array<i64: 1, 2, 512>}]} {
    %0 = arith.index_cast %arg0 : i32 to index
    %1 = memref.load %arg2[%0] : memref<2xf32, #tpu.memory_space<smem>>
    %c0 = arith.constant 0 : index
    %c0_0 = arith.constant 0 : index
    %c0_1 = arith.constant 0 : index
    %2 = vector.load %arg3[%c0, %c0_0, %c0_1] : memref<1x2x512xf32, #tpu.memory_space<vmem>>, vector<1x2x512xf32>
    %3 = vector.broadcast %1 : f32 to vector<1x2x512xf32>
    %4 = arith.mulf %2, %3 : vector<1x2x512xf32>
    %cst = arith.constant 0.000000e+00 : f32
    %cst_2 = arith.constant 1.000000e+00 : f32
    %5 = vector.broadcast %cst : f32 to vector<1x2x512xf32>
    %6 = arith.maximumf %5, %4 : vector<1x2x512xf32>
    %7 = vector.broadcast %cst_2 : f32 to vector<1x2x512xf32>
    %8 = arith.minimumf %7, %6 : vector<1x2x512xf32>
    %c0_3 = arith.constant 0 : index
    %c0_4 = arith.constant 0 : index
    %c0_5 = arith.constant 0 : index
    %9 = vector.load %arg4[%c0_3, %c0_4, %c0_5] : memref<1x2x512xf32, #tpu.memory_space<vmem>>, vector<1x2x512xf32>
    tpu.vector_store %arg4[%c0_3, %c0_4, %c0_5], %8 {strides = array<i32>} : memref<1x2x512xf32, #tpu.memory_space<vmem>>, vector<1x2x512xf32>,
    return
  }
  func.func @transform_0(%arg0: i32, %arg1: i32, %arg2: memref<2xf32, #tpu.memory_space<smem>>) -> (i32, i32, i32) {
    %c0_i32 = arith.constant 0 : i32
    %c0_i32_0 = arith.constant 0 : i32
    return %arg0, %arg1, %c0_i32 : i32, i32, i32
  }
  func.func @transform_1(%arg0: i32, %arg1: i32, %arg2: memref<2xf32, #tpu.memory_space<smem>>) -> (i32, i32, i32) {
    %c0_i32 = arith.constant 0 : i32
    %c0_i32_0 = arith.constant 0 : i32
    return %arg0, %arg1, %c0_i32 : i32, i32, i32
  }
}

</mosaic_0001>

<bundles_post_ra>
// kernel: random_contrast_pallas.1
= control target key start
LH: loop header
LB: loop body
LE: loop exit
PB: predicated region body
PF: predicated region fallthrough
CT: control target
= control target key end

     0   :  { %s375_s0 = inlined_call_operand.vmem [shape: f32[2], index: 0, kind: input, shape index: {}]   ;;  %s376_s1 = inlined_call_operand.vmem [shape: f32[2,2,512], index: 1, kind: input, shape index: {}, may-alias: {1,2}]   ;;  %s377_s2 = inlined_call_operand.vmem [shape: f32[2,2,512], index: 2, kind: output, shape index: {}, may-alias: {1,2}]  }
   0x1   :  { %s7_s11 = sshll.u32 %s375_s0, 4  ;;  %s8_s11 = int_to_ptr.vmem [resolvable:$true] %s7_s11 }
   0x2   :  { %s297_s12 = scalar_lea.vmem %s8_s11, 16  ;;  %p302_p1 = scmp.lt.s32.totalorder %s8_s11, %s8_s11 }
   0x3   :  { %p298_p0 = scmp.ne.s32.totalorder %s8_s11, %s297_s12  ;;  %p303_p2 = scmp.lt.s32.totalorder %s297_s12, %s297_s12 }
   0x5   :  { %p304_p3 = por %p303_p2, %p302_p1 }
   0x7   :  { %p305_p4 = pnand %p304_p3, %p298_p0 }
   0x9   :  { %308 = shalt.err (!%p305_p4)  }
   0xa   :  { %s335_s13 = smov [#allocation3]  }
   0xb   :  { %10 = dma.vmem_to_smem %s8_s11, 16, %s335_s13, [#allocation2] }
   0xc   :  { %321 = dma.done.wait [#allocation2], 16 }
   0xd   :  { %322 = vsyncadd [#allocation2], 4294967280 }
   0xe   :  { %12 = sfence }
   0xf   :  { %s354_s14 = smov 0   ;;  %s356_s15 = smov 0  }
  0x10   :  { %s358_s16 = smov 0  }
  0x11 LB: > { %s30_s0 = sadd.s32 1, %s329_s15  ;;  %p263_p5 = scmp.ge.s32.totalorder %s333_s16, 1  ;;  %s333_s16 = sphi %s358_s16, %s18_s16   ;;  %s329_s15 = sphi %s356_s15, %s379_s15   ;;  %s325_s14 = sphi %s354_s14, %s378_s14  }
  0x12   : > { %p32_p6 = scmp.ge.s32.totalorder %s30_s0, 2  ;;  %p114_p7 = scmp.lt.s32.totalorder %s333_s16, 3 }
  0x14   : > { %s381_s0 = smov (%p32_p6, %s30_s0), 0  ;;  %p115_p8 = pnand %p263_p5, %p114_p7 }
  0x15   : > { %p142_p9 = scmp.lt.s32.totalorder (!%p115_p8), %s325_s14, 1  ;;  %s160_s17 = sld [smem:[#allocation3 + %s325_s14]] (!%p115_p8) }
  0x16   : > { %118 = sbr.rel (%p115_p8) target bundleno = 40 (0x28), region = 24 }
  0x1b   : > { %v162_v1 = vstv (!%p115_p8), %s160_s17 }
  0x1d   : > { %s383_s14 = smov (!%p142_p9, %s325_s14), 1 }
  0x1e   : > { %s270_s18 = sshll.u32 %s383_s14, 3 }
  0x1f   : > { %s150_s21 = scalar_lea.vmem %s376_s1, %s270_s18  ;;  %s159_s24 = scalar_lea.vmem %s377_s2, %s270_s18 }
  0x20   : > { %v161_v0 = vld [vmem:[%s150_s21] sm:$0xff] }
  0x21   : > { %v163_v2 = vmul.f32 %v162_v1, %v161_v0 }
  0x23   : > { %v164_v3 = vmax.f32 %v163_v2, 0.0 }
  0x25   : > { %v165_v4 = vmin.f32 %v164_v3, 1.0 }
  0x27   : > { %166 = vst [vmem:[%s159_s24] sm:$0xff] %v165_v4 }
  0x28 PF: > { %s18_s16 = sadd.s32 1, %s333_s16   ;;  %s378_s14 = smov %s329_s15 }
  0x29   : > { %p15_p10 = scmp.ge.s32.totalorder %s18_s16, 4   ;;  %s379_s15 = smov %s381_s0 }
  0x2b   :  { %17 = sbr.rel (!%p15_p10) target bundleno = 17 (0x11), region = 54 }

</bundles_post_ra>
